<compile_context>
chip_gen: v5e
topology: v5e:2x2
jax: 0.10.0
libtpu: 0.0.40
codegen_flags: <defaults>
</compile_context>

<pallas_src>
import math

import jax
import jax.numpy as jnp
from jax.experimental import pallas as pl
from jax.experimental.pallas import tpu as pltpu


def _mha_kernel(n_heads, head_dim, inv_scale):
    """Per (batch_block, head) kernel body."""

    def kernel(q_ref, k_ref, v_ref,
               wq_ref, bq_ref, wk_ref, bk_ref, wv_ref, bv_ref,
               wo_ref, bo_ref,
               out_ref, attn_ref):
        h = pl.program_id(1)
        Bb, S, H = q_ref.shape
        hd = head_dim

        # Flatten the batch block to (Bb*S, H) rows; bf16 operands, f32 acc.
        q2 = q_ref[...].reshape(Bb * S, H).astype(jnp.bfloat16)
        k2 = k_ref[...].reshape(Bb * S, H).astype(jnp.bfloat16)
        v2 = v_ref[...].reshape(Bb * S, H).astype(jnp.bfloat16)

        # This head's slice of the Q/K/V projections: y = x @ W_h + b_h.
        Qh = (jnp.dot(q2, wq_ref[0].astype(jnp.bfloat16),
                      preferred_element_type=jnp.float32) + bq_ref[0])
        Kh = (jnp.dot(k2, wk_ref[0].astype(jnp.bfloat16),
                      preferred_element_type=jnp.float32) + bk_ref[0])
        Vh = (jnp.dot(v2, wv_ref[0].astype(jnp.bfloat16),
                      preferred_element_type=jnp.float32) + bv_ref[0])

        Q3 = Qh.reshape(Bb, S, hd)
        K3 = Kh.reshape(Bb, S, hd)
        V3 = Vh.reshape(Bb, S, hd)

        # energy[b,q,k] = <Q3[b,q], K3[b,k]> / sqrt(hd); contraction over the
        # last dim of both operands, no materialized transpose.
        energy = jnp.einsum(
            "bqd,bkd->bqk",
            Q3.astype(jnp.bfloat16), K3.astype(jnp.bfloat16),
            preferred_element_type=jnp.float32) * inv_scale

        # Numerically-stable softmax in f32; divide goes to the EUP.
        m = jnp.max(energy, axis=-1, keepdims=True)
        e = jnp.exp(energy - m)
        denom = jnp.sum(e, axis=-1, keepdims=True)
        attn = e * pl.reciprocal(denom, approx=True)          # (Bb, S, S) f32

        attn_ref[:, 0, :, :] = attn.astype(attn_ref.dtype)

        ctx = jnp.einsum(
            "bqk,bkd->bqd",
            attn.astype(jnp.bfloat16), V3.astype(jnp.bfloat16),
            preferred_element_type=jnp.float32)               # (Bb, S, hd)

        # Output projection: concat-over-heads @ Wo == sum_h ctx_h @ Wo_h.
        contrib = jnp.dot(
            ctx.reshape(Bb * S, hd).astype(jnp.bfloat16),
            wo_ref[0].astype(jnp.bfloat16),
            preferred_element_type=jnp.float32).reshape(Bb, S, H)

        @pl.when(h == 0)
        def _():
            out_ref[...] = jnp.broadcast_to(bo_ref[...], out_ref.shape)

        out_ref[...] += contrib

    return kernel


def _pick_block_b(batch, seq):
    """Pack enough batch rows per grid step to feed the MXU (~128 rows) while
    keeping >= 2 steps on the parallel batch axis (v7x has 2 TensorCores)."""
    target = max(1, 128 // max(seq, 1))
    divisors = [d for d in range(1, batch + 1) if batch % d == 0]
    cands = [d for d in divisors if d <= target and batch // d >= 2]
    if not cands:
        cands = [d for d in divisors if d <= target] or [1]
    return max(cands)


def multi_head_attention(query, key, value, params, n_heads, block_b=None):
    """query/key/value: (B, S, H) float32.

    Returns (out (B, S, H) f32, attention (B, n_heads, S, S) f32), matching
    MultiHeadAttentionLayer.forward in inference mode (dropout = identity).
    """
    B, S, H = query.shape
    assert H % n_heads == 0
    hd = H // n_heads
    inv_scale = 1.0 / math.sqrt(hd)

    wq, bq, wk, bk, wv, bv, wo, bo = params

    # Head-major weight/bias layouts so BlockSpecs hand the kernel one head's
    # slice with full (lane-dense) last dims. One-time host-side rearrangement
    # (could be precomputed/cached by the caller).
    wq_h = wq.reshape(H, n_heads, hd).transpose(1, 0, 2)   # (nh, H, hd)
    wk_h = wk.reshape(H, n_heads, hd).transpose(1, 0, 2)
    wv_h = wv.reshape(H, n_heads, hd).transpose(1, 0, 2)
    wo_h = wo.reshape(n_heads, hd, H)                      # (nh, hd, H)
    bq_h = bq.reshape(n_heads, 1, hd)
    bk_h = bk.reshape(n_heads, 1, hd)
    bv_h = bv.reshape(n_heads, 1, hd)
    bo_r = bo.reshape(1, 1, H)

    if block_b is None:
        block_b = _pick_block_b(B, S)
    assert B % block_b == 0
    nb = B // block_b

    seq_spec = pl.BlockSpec((block_b, S, H), lambda b, h: (b, 0, 0))
    w_in_spec = pl.BlockSpec((1, H, hd), lambda b, h: (h, 0, 0))
    b_in_spec = pl.BlockSpec((1, 1, hd), lambda b, h: (h, 0, 0))
    wo_spec = pl.BlockSpec((1, hd, H), lambda b, h: (h, 0, 0))
    bo_spec = pl.BlockSpec((1, 1, H), lambda b, h: (0, 0, 0))

    out_shape = (
        jax.ShapeDtypeStruct((B, S, H), jnp.float32),
        jax.ShapeDtypeStruct((B, n_heads, S, S), jnp.float32),
    )
    out_specs = (
        pl.BlockSpec((block_b, S, H), lambda b, h: (b, 0, 0)),      # accum over h
        pl.BlockSpec((block_b, 1, S, S), lambda b, h: (b, h, 0, 0)),
    )

    cost = pl.CostEstimate(
        flops=B * (8 * S * H * H + 4 * n_heads * S * S * hd),
        transcendentals=B * n_heads * S * S,
        bytes_accessed=4 * (4 * B * S * H + 4 * H * H + 4 * H
                            + B * n_heads * S * S),
    )

    fn = pl.pallas_call(
        _mha_kernel(n_heads, hd, inv_scale),
        out_shape=out_shape,
        grid=(nb, n_heads),
        in_specs=[
            seq_spec, seq_spec, seq_spec,   # q, k, v
            w_in_spec, b_in_spec,           # fc_q
            w_in_spec, b_in_spec,           # fc_k
            w_in_spec, b_in_spec,           # fc_v
            wo_spec, bo_spec,               # fc_o
        ],
        out_specs=out_specs,
        compiler_params=pltpu.CompilerParams(
            dimension_semantics=("parallel", "arbitrary")),
        cost_estimate=cost,
    )
    return fn(query, key, value,
              wq_h, bq_h, wk_h, bk_h, wv_h, bv_h, wo_h, bo_r)


def init_linear(key, in_dim, out_dim):
    """Deterministic PyTorch-style nn.Linear init. Weight returned as (in, out)."""
    kw, kb = jax.random.split(key)
    bound = 1.0 / math.sqrt(in_dim)
    # PyTorch stores W as (out, in); we store transposed (in, out) for x @ W.
    w = jax.random.uniform(kw, (in_dim, out_dim), jnp.float32, -bound, bound)
    b = jax.random.uniform(kb, (1, out_dim), jnp.float32, -bound, bound)
    return w, b


def reference_mha(query, key, value, params, n_heads):
    """Pure-JAX f32 reference mirroring the PyTorch forward (dropout = identity)."""
    wq, bq, wk, bk, wv, bv, wo, bo = params
    B, S, H = query.shape
    hd = H // n_heads
    scale = math.sqrt(hd)

    def proj(x, w, b):
        return x @ w + b[0]

    def split(x):
        return x.reshape(B, S, n_heads, hd).transpose(0, 2, 1, 3)

    Q = split(proj(query, wq, bq))
    K = split(proj(key, wk, bk))
    V = split(proj(value, wv, bv))
    energy = jnp.einsum("bhqd,bhkd->bhqk", Q, K) / scale
    attn = jax.nn.softmax(energy, axis=-1)
    x = jnp.einsum("bhqk,bhkd->bhqd", attn, V)
    x = x.transpose(0, 2, 1, 3).reshape(B, S, H)
    return x @ wo + bo[0], attn


if __name__ == "__main__":
    # Small shapes: batch=2, seq=8, hid_dim=32, n_heads=4 (head_dim=8).
    B, S, H, NH = 2, 8, 32, 4

    root = jax.random.PRNGKey(0)
    k_q, k_k, k_v, k_pq, k_pk, k_pv, k_po = jax.random.split(root, 7)

    query = jax.random.normal(k_q, (B, S, H), jnp.float32)
    key_ = jax.random.normal(k_k, (B, S, H), jnp.float32)
    value = jax.random.normal(k_v, (B, S, H), jnp.float32)

    wq, bq = init_linear(k_pq, H, H)
    wk, bk = init_linear(k_pk, H, H)
    wv, bv = init_linear(k_pv, H, H)
    wo, bo = init_linear(k_po, H, H)
    params = (wq, bq, wk, bk, wv, bv, wo, bo)

    out, attn = multi_head_attention(query, key_, value, params, NH)
    jax.block_until_ready((out, attn))

    # Sanity check against a pure-f32 JAX reference. The kernel uses bf16 MXU
    # operands (f32 accumulation) and an approximate EUP reciprocal in the
    # softmax, so tolerances are relaxed accordingly (~1% level differences).
    ref_out, ref_attn = reference_mha(query, key_, value, params, NH)
    assert out.shape == (B, S, H) and attn.shape == (B, NH, S, S)
    assert jnp.allclose(out, ref_out, atol=3e-2, rtol=3e-2)
    assert jnp.allclose(attn, ref_attn, atol=2e-2, rtol=2e-2)

    print("KERNEL_OK")
</pallas_src>

<mosaic_0001>
module attributes {stable_mosaic.version = 11 : i64} {
  func.func @kernel(%arg0: i32, %arg1: i32, %arg2: memref<1x8x32xf32, #tpu.memory_space<vmem>>, %arg3: memref<1x8x32xf32, #tpu.memory_space<vmem>>, %arg4: memref<1x8x32xf32, #tpu.memory_space<vmem>>, %arg5: memref<1x32x8xf32, #tpu.memory_space<vmem>>, %arg6: memref<1x1x8xf32, #tpu.memory_space<vmem>>, %arg7: memref<1x32x8xf32, #tpu.memory_space<vmem>>, %arg8: memref<1x1x8xf32, #tpu.memory_space<vmem>>, %arg9: memref<1x32x8xf32, #tpu.memory_space<vmem>>, %arg10: memref<1x1x8xf32, #tpu.memory_space<vmem>>, %arg11: memref<1x8x32xf32, #tpu.memory_space<vmem>>, %arg12: memref<1x1x32xf32, #tpu.memory_space<vmem>>, %arg13: memref<1x8x32xf32, #tpu.memory_space<vmem>>, %arg14: memref<1x1x8x8xf32, #tpu.memory_space<vmem>>) attributes {dimension_semantics = [#tpu.dimension_semantics<parallel>, #tpu.dimension_semantics<arbitrary>], iteration_bounds = array<i64: 2, 4>, scalar_prefetch = 0 : i64, scratch_operands = 0 : i64, tpu.core_type = #tpu.core_type<tc>, window_params = [{transform_indices = @transform_0, window_bounds = array<i64: 1, 8, 32>}, {transform_indices = @transform_1, window_bounds = array<i64: 1, 8, 32>}, {transform_indices = @transform_2, window_bounds = array<i64: 1, 8, 32>}, {transform_indices = @transform_3, window_bounds = array<i64: 1, 32, 8>}, {transform_indices = @transform_4, window_bounds = array<i64: 1, 1, 8>}, {transform_indices = @transform_5, window_bounds = array<i64: 1, 32, 8>}, {transform_indices = @transform_6, window_bounds = array<i64: 1, 1, 8>}, {transform_indices = @transform_7, window_bounds = array<i64: 1, 32, 8>}, {transform_indices = @transform_8, window_bounds = array<i64: 1, 1, 8>}, {transform_indices = @transform_9, window_bounds = array<i64: 1, 8, 32>}, {pipeline_mode = #tpu.pipeline_mode<synchronous>, transform_indices = @transform_10, window_bounds = array<i64: 1, 1, 32>}, {transform_indices = @transform_11, window_bounds = array<i64: 1, 8, 32>}, {transform_indices = @transform_12, window_bounds = array<i64: 1, 1, 8, 8>}]} {
    %c0 = arith.constant 0 : index
    %c0_0 = arith.constant 0 : index
    %c0_1 = arith.constant 0 : index
    %0 = vector.load %arg2[%c0, %c0_0, %c0_1] : memref<1x8x32xf32, #tpu.memory_space<vmem>>, vector<1x8x32xf32>
    %1 = vector.shape_cast %0 : vector<1x8x32xf32> to vector<8x32xf32>
    %2 = arith.truncf %1 : vector<8x32xf32> to vector<8x32xbf16>
    %c0_2 = arith.constant 0 : index
    %c0_3 = arith.constant 0 : index
    %c0_4 = arith.constant 0 : index
    %3 = vector.load %arg3[%c0_2, %c0_3, %c0_4] : memref<1x8x32xf32, #tpu.memory_space<vmem>>, vector<1x8x32xf32>
    %4 = vector.shape_cast %3 : vector<1x8x32xf32> to vector<8x32xf32>
    %5 = arith.truncf %4 : vector<8x32xf32> to vector<8x32xbf16>
    %c0_5 = arith.constant 0 : index
    %c0_6 = arith.constant 0 : index
    %c0_7 = arith.constant 0 : index
    %6 = vector.load %arg4[%c0_5, %c0_6, %c0_7] : memref<1x8x32xf32, #tpu.memory_space<vmem>>, vector<1x8x32xf32>
    %7 = vector.shape_cast %6 : vector<1x8x32xf32> to vector<8x32xf32>
    %8 = arith.truncf %7 : vector<8x32xf32> to vector<8x32xbf16>
    %c0_8 = arith.constant 0 : index
    %c0_9 = arith.constant 0 : index
    %c0_10 = arith.constant 0 : index
    %9 = vector.load %arg5[%c0_8, %c0_9, %c0_10] : memref<1x32x8xf32, #tpu.memory_space<vmem>>, vector<1x32x8xf32>
    %10 = vector.shape_cast %9 : vector<1x32x8xf32> to vector<32x8xf32>
    %11 = arith.truncf %10 : vector<32x8xf32> to vector<32x8xbf16>
    %cst = arith.constant dense<0.000000e+00> : vector<8x8xf32>
    %12 = tpu.matmul %2, %11, %cst {dimension_numbers = #tpu.dot_dimension_numbers<[1], [0], [0], [1], [0, 0, 1, 1], [], []>} : vector<8x32xbf16>, vector<32x8xbf16>, vector<8x8xf32> -> vector<8x8xf32>
    %c0_11 = arith.constant 0 : index
    %c0_12 = arith.constant 0 : index
    %c0_13 = arith.constant 0 : index
    %13 = vector.load %arg6[%c0_11, %c0_12, %c0_13] : memref<1x1x8xf32, #tpu.memory_space<vmem>>, vector<1x1x8xf32>
    %14 = vector.shape_cast %13 : vector<1x1x8xf32> to vector<1x8xf32>
    %15 = vector.broadcast %14 : vector<1x8xf32> to vector<8x8xf32>
    %16 = arith.addf %12, %15 : vector<8x8xf32>
    %c0_14 = arith.constant 0 : index
    %c0_15 = arith.constant 0 : index
    %c0_16 = arith.constant 0 : index
    %17 = vector.load %arg7[%c0_14, %c0_15, %c0_16] : memref<1x32x8xf32, #tpu.memory_space<vmem>>, vector<1x32x8xf32>
    %18 = vector.shape_cast %17 : vector<1x32x8xf32> to vector<32x8xf32>
    %19 = arith.truncf %18 : vector<32x8xf32> to vector<32x8xbf16>
    %cst_17 = arith.constant dense<0.000000e+00> : vector<8x8xf32>
    %20 = tpu.matmul %5, %19, %cst_17 {dimension_numbers = #tpu.dot_dimension_numbers<[1], [0], [0], [1], [0, 0, 1, 1], [], []>} : vector<8x32xbf16>, vector<32x8xbf16>, vector<8x8xf32> -> vector<8x8xf32>
    %c0_18 = arith.constant 0 : index
    %c0_19 = arith.constant 0 : index
    %c0_20 = arith.constant 0 : index
    %21 = vector.load %arg8[%c0_18, %c0_19, %c0_20] : memref<1x1x8xf32, #tpu.memory_space<vmem>>, vector<1x1x8xf32>
    %22 = vector.shape_cast %21 : vector<1x1x8xf32> to vector<1x8xf32>
    %23 = vector.broadcast %22 : vector<1x8xf32> to vector<8x8xf32>
    %24 = arith.addf %20, %23 : vector<8x8xf32>
    %c0_21 = arith.constant 0 : index
    %c0_22 = arith.constant 0 : index
    %c0_23 = arith.constant 0 : index
    %25 = vector.load %arg9[%c0_21, %c0_22, %c0_23] : memref<1x32x8xf32, #tpu.memory_space<vmem>>, vector<1x32x8xf32>
    %26 = vector.shape_cast %25 : vector<1x32x8xf32> to vector<32x8xf32>
    %27 = arith.truncf %26 : vector<32x8xf32> to vector<32x8xbf16>
    %cst_24 = arith.constant dense<0.000000e+00> : vector<8x8xf32>
    %28 = tpu.matmul %8, %27, %cst_24 {dimension_numbers = #tpu.dot_dimension_numbers<[1], [0], [0], [1], [0, 0, 1, 1], [], []>} : vector<8x32xbf16>, vector<32x8xbf16>, vector<8x8xf32> -> vector<8x8xf32>
    %c0_25 = arith.constant 0 : index
    %c0_26 = arith.constant 0 : index
    %c0_27 = arith.constant 0 : index
    %29 = vector.load %arg10[%c0_25, %c0_26, %c0_27] : memref<1x1x8xf32, #tpu.memory_space<vmem>>, vector<1x1x8xf32>
    %30 = vector.shape_cast %29 : vector<1x1x8xf32> to vector<1x8xf32>
    %31 = vector.broadcast %30 : vector<1x8xf32> to vector<8x8xf32>
    %32 = arith.addf %28, %31 : vector<8x8xf32>
    %33 = vector.shape_cast %16 : vector<8x8xf32> to vector<1x8x8xf32>
    %34 = vector.shape_cast %24 : vector<8x8xf32> to vector<1x8x8xf32>
    %35 = vector.shape_cast %32 : vector<8x8xf32> to vector<1x8x8xf32>
    %36 = arith.truncf %33 : vector<1x8x8xf32> to vector<1x8x8xbf16>
    %37 = arith.truncf %34 : vector<1x8x8xf32> to vector<1x8x8xbf16>
    "tpu.trace_start"() <{level = 10 : i32, message = "bqd,bkd->bqk"}> : () -> ()
    %cst_28 = arith.constant dense<0.000000e+00> : vector<1x8x8xf32>
    %38 = tpu.matmul %36, %37, %cst_28 {dimension_numbers = #tpu.dot_dimension_numbers<[2], [2], [1], [1], [0, 0, 0, 1, 1, 1], [0], [0]>} : vector<1x8x8xbf16>, vector<1x8x8xbf16>, vector<1x8x8xf32> -> vector<1x8x8xf32>
    "tpu.trace_stop"() : () -> ()
    %cst_29 = arith.constant 0.353553385 : f32
    %39 = vector.broadcast %cst_29 : f32 to vector<1x8x8xf32>
    %40 = arith.mulf %38, %39 : vector<1x8x8xf32>
    %cst_30 = arith.constant dense<0xFF800000> : vector<1x8xf32>
    %41 = vector.multi_reduction <maximumf>, %40, %cst_30 [2] : vector<1x8x8xf32> to vector<1x8xf32>
    %42 = vector.shape_cast %41 : vector<1x8xf32> to vector<1x8x1xf32>
    %43 = vector.broadcast %42 : vector<1x8x1xf32> to vector<1x8x8xf32>
    %44 = arith.subf %40, %43 : vector<1x8x8xf32>
    %45 = math.exp %44 : vector<1x8x8xf32>
    %cst_31 = arith.constant dense<0.000000e+00> : vector<1x8xf32>
    %46 = vector.multi_reduction <add>, %45, %cst_31 [2] : vector<1x8x8xf32> to vector<1x8xf32>
    %47 = vector.shape_cast %46 : vector<1x8xf32> to vector<1x8x1xf32>
    %48 = tpu.reciprocal %47 {approx = true} : vector<1x8x1xf32> -> vector<1x8x1xf32>
    %49 = vector.broadcast %48 : vector<1x8x1xf32> to vector<1x8x8xf32>
    %50 = arith.mulf %45, %49 : vector<1x8x8xf32>
    %c0_32 = arith.constant 0 : index
    %c0_33 = arith.constant 0 : index
    %c0_34 = arith.constant 0 : index
    %c0_35 = arith.constant 0 : index
    %51 = vector.load %arg14[%c0_32, %c0_33, %c0_34, %c0_35] : memref<1x1x8x8xf32, #tpu.memory_space<vmem>>, vector<1x1x8x8xf32>
    %52 = vector.shape_cast %51 : vector<1x1x8x8xf32> to vector<1x8x8xf32>
    %53 = vector.shape_cast %50 : vector<1x8x8xf32> to vector<1x1x8x8xf32>
    tpu.vector_store %arg14[%c0_32, %c0_33, %c0_34, %c0_35], %53 {strides = array<i32>} : memref<1x1x8x8xf32, #tpu.memory_space<vmem>>, vector<1x1x8x8xf32>,
    %54 = arith.truncf %50 : vector<1x8x8xf32> to vector<1x8x8xbf16>
    %55 = arith.truncf %35 : vector<1x8x8xf32> to vector<1x8x8xbf16>
    "tpu.trace_start"() <{level = 10 : i32, message = "bqk,bkd->bqd"}> : () -> ()
    %cst_36 = arith.constant dense<0.000000e+00> : vector<1x8x8xf32>
    %56 = tpu.matmul %54, %55, %cst_36 {dimension_numbers = #tpu.dot_dimension_numbers<[2], [1], [1], [2], [0, 0, 0, 1, 1, 2], [0], [0]>} : vector<1x8x8xbf16>, vector<1x8x8xbf16>, vector<1x8x8xf32> -> vector<1x8x8xf32>
    "tpu.trace_stop"() : () -> ()
    %57 = vector.shape_cast %56 : vector<1x8x8xf32> to vector<8x8xf32>
    %58 = arith.truncf %57 : vector<8x8xf32> to vector<8x8xbf16>
    %c0_37 = arith.constant 0 : index
    %c0_38 = arith.constant 0 : index
    %c0_39 = arith.constant 0 : index
    %59 = vector.load %arg11[%c0_37, %c0_38, %c0_39] : memref<1x8x32xf32, #tpu.memory_space<vmem>>, vector<1x8x32xf32>
    %60 = vector.shape_cast %59 : vector<1x8x32xf32> to vector<8x32xf32>
    %61 = arith.truncf %60 : vector<8x32xf32> to vector<8x32xbf16>
    %cst_40 = arith.constant dense<0.000000e+00> : vector<8x32xf32>
    %62 = tpu.matmul %58, %61, %cst_40 {dimension_numbers = #tpu.dot_dimension_numbers<[1], [0], [0], [1], [0, 0, 1, 1], [], []>} : vector<8x8xbf16>, vector<8x32xbf16>, vector<8x32xf32> -> vector<8x32xf32>
    %63 = vector.shape_cast %62 : vector<8x32xf32> to vector<1x8x32xf32>
    %c0_i32 = arith.constant 0 : i32
    %64 = arith.cmpi eq, %arg1, %c0_i32 : i32
    %65 = arith.extui %64 : i1 to i32
    %c0_i32_41 = arith.constant 0 : i32
    %66 = arith.cmpi ne, %65, %c0_i32_41 : i32
    scf.if %66 {
      %c0_48 = arith.constant 0 : index
      %c0_49 = arith.constant 0 : index
      %c0_50 = arith.constant 0 : index
      %70 = vector.load %arg12[%c0_48, %c0_49, %c0_50] : memref<1x1x32xf32, #tpu.memory_space<vmem>>, vector<1x1x32xf32>
      %71 = vector.shape_cast %70 : vector<1x1x32xf32> to vector<1x1x32xf32>
      %72 = vector.broadcast %71 : vector<1x1x32xf32> to vector<1x8x32xf32>
      %c0_51 = arith.constant 0 : index
      %c0_52 = arith.constant 0 : index
      %c0_53 = arith.constant 0 : index
      %73 = vector.load %arg13[%c0_51, %c0_52, %c0_53] : memref<1x8x32xf32, #tpu.memory_space<vmem>>, vector<1x8x32xf32>
      tpu.vector_store %arg13[%c0_51, %c0_52, %c0_53], %72 {strides = array<i32>} : memref<1x8x32xf32, #tpu.memory_space<vmem>>, vector<1x8x32xf32>,
    } else {
    }
    %c0_42 = arith.constant 0 : index
    %c0_43 = arith.constant 0 : index
    %c0_44 = arith.constant 0 : index
    %67 = vector.load %arg13[%c0_42, %c0_43, %c0_44] : memref<1x8x32xf32, #tpu.memory_space<vmem>>, vector<1x8x32xf32>
    %68 = arith.addf %67, %63 : vector<1x8x32xf32>
    %c0_45 = arith.constant 0 : index
    %c0_46 = arith.constant 0 : index
    %c0_47 = arith.constant 0 : index
    %69 = vector.load %arg13[%c0_45, %c0_46, %c0_47] : memref<1x8x32xf32, #tpu.memory_space<vmem>>, vector<1x8x32xf32>
    tpu.vector_store %arg13[%c0_45, %c0_46, %c0_47], %68 {strides = array<i32>} : memref<1x8x32xf32, #tpu.memory_space<vmem>>, vector<1x8x32xf32>,
    return
  }
  func.func @transform_0(%arg0: i32, %arg1: i32) -> (i32, i32, i32) {
    %c0_i32 = arith.constant 0 : i32
    %c0_i32_0 = arith.constant 0 : i32
    %c0_i32_1 = arith.constant 0 : i32
    return %arg0, %c0_i32, %c0_i32_0 : i32, i32, i32
  }
  func.func @transform_1(%arg0: i32, %arg1: i32) -> (i32, i32, i32) {
    %c0_i32 = arith.constant 0 : i32
    %c0_i32_0 = arith.constant 0 : i32
    %c0_i32_1 = arith.constant 0 : i32
    return %arg0, %c0_i32, %c0_i32_0 : i32, i32, i32
  }
  func.func @transform_2(%arg0: i32, %arg1: i32) -> (i32, i32, i32) {
    %c0_i32 = arith.constant 0 : i32
    %c0_i32_0 = arith.constant 0 : i32
    %c0_i32_1 = arith.constant 0 : i32
    return %arg0, %c0_i32, %c0_i32_0 : i32, i32, i32
  }
  func.func @transform_3(%arg0: i32, %arg1: i32) -> (i32, i32, i32) {
    %c0_i32 = arith.constant 0 : i32
    %c0_i32_0 = arith.constant 0 : i32
    %c0_i32_1 = arith.constant 0 : i32
    return %arg1, %c0_i32, %c0_i32_0 : i32, i32, i32
  }
  func.func @transform_4(%arg0: i32, %arg1: i32) -> (i32, i32, i32) {
    %c0_i32 = arith.constant 0 : i32
    %c0_i32_0 = arith.constant 0 : i32
    %c0_i32_1 = arith.constant 0 : i32
    return %arg1, %c0_i32, %c0_i32_0 : i32, i32, i32
  }
  func.func @transform_5(%arg0: i32, %arg1: i32) -> (i32, i32, i32) {
    %c0_i32 = arith.constant 0 : i32
    %c0_i32_0 = arith.constant 0 : i32
    %c0_i32_1 = arith.constant 0 : i32
    return %arg1, %c0_i32, %c0_i32_0 : i32, i32, i32
  }
  func.func @transform_6(%arg0: i32, %arg1: i32) -> (i32, i32, i32) {
    %c0_i32 = arith.constant 0 : i32
    %c0_i32_0 = arith.constant 0 : i32
    %c0_i32_1 = arith.constant 0 : i32
    return %arg1, %c0_i32, %c0_i32_0 : i32, i32, i32
  }
  func.func @transform_7(%arg0: i32, %arg1: i32) -> (i32, i32, i32) {
    %c0_i32 = arith.constant 0 : i32
    %c0_i32_0 = arith.constant 0 : i32
    %c0_i32_1 = arith.constant 0 : i32
    return %arg1, %c0_i32, %c0_i32_0 : i32, i32, i32
  }
  func.func @transform_8(%arg0: i32, %arg1: i32) -> (i32, i32, i32) {
    %c0_i32 = arith.constant 0 : i32
    %c0_i32_0 = arith.constant 0 : i32
    %c0_i32_1 = arith.constant 0 : i32
    return %arg1, %c0_i32, %c0_i32_0 : i32, i32, i32
  }
  func.func @transform_9(%arg0: i32, %arg1: i32) -> (i32, i32, i32) {
    %c0_i32 = arith.constant 0 : i32
    %c0_i32_0 = arith.constant 0 : i32
    %c0_i32_1 = arith.constant 0 : i32
    return %arg1, %c0_i32, %c0_i32_0 : i32, i32, i32
  }
  func.func @transform_10(%arg0: i32, %arg1: i32) -> (i32, i32, i32) {
    %c0_i32 = arith.constant 0 : i32
    %c0_i32_0 = arith.constant 0 : i32
    %c0_i32_1 = arith.constant 0 : i32
    %c0_i32_2 = arith.constant 0 : i32
    return %c0_i32, %c0_i32_0, %c0_i32_1 : i32, i32, i32
  }
  func.func @transform_11(%arg0: i32, %arg1: i32) -> (i32, i32, i32) {
    %c0_i32 = arith.constant 0 : i32
    %c0_i32_0 = arith.constant 0 : i32
    %c0_i32_1 = arith.constant 0 : i32
    return %arg0, %c0_i32, %c0_i32_0 : i32, i32, i32
  }
  func.func @transform_12(%arg0: i32, %arg1: i32) -> (i32, i32, i32, i32) {
    %c0_i32 = arith.constant 0 : i32
    %c0_i32_0 = arith.constant 0 : i32
    %c0_i32_1 = arith.constant 0 : i32
    return %arg0, %arg1, %c0_i32, %c0_i32_0 : i32, i32, i32, i32
  }
}

</mosaic_0001>

<bundles_post_ra>
// kernel: tpu_custom_call.1
= control target key start
LH: loop header
LB: loop body
LE: loop exit
PB: predicated region body
PF: predicated region fallthrough
CT: control target
= control target key end

     0   :  { %s1643_s0 = inlined_call_operand.vmem [shape: f32[2,8,32], index: 0, kind: input, shape index: {}]   ;;  %s1644_s1 = inlined_call_operand.vmem [shape: f32[2,8,32], index: 1, kind: input, shape index: {}]   ;;  %s1645_s2 = inlined_call_operand.vmem [shape: f32[2,8,32], index: 2, kind: input, shape index: {}]   ;;  %s1646_s3 = inlined_call_operand.vmem [shape: f32[4,32,8], index: 3, kind: input, shape index: {}]   ;;  %s1647_s4 = inlined_call_operand.vmem [shape: f32[4,1,8], index: 4, kind: input, shape index: {}]   ;;  %s1648_s5 = inlined_call_operand.vmem [shape: f32[4,32,8], index: 5, kind: input, shape index: {}]   ;;  %s1649_s6 = inlined_call_operand.vmem [shape: f32[4,1,8], index: 6, kind: input, shape index: {}]   ;;  %s1650_s7 = inlined_call_operand.vmem [shape: f32[4,32,8], index: 7, kind: input, shape index: {}]   ;;  %s1651_s8 = inlined_call_operand.vmem [shape: f32[4,1,8], index: 8, kind: input, shape index: {}]   ;;  %s1652_s9 = inlined_call_operand.vmem [shape: f32[4,8,32], index: 9, kind: input, shape index: {}]   ;;  %s1653_s10 = inlined_call_operand.vmem [shape: f32[1,1,32], index: 10, kind: input, shape index: {}]   ;;  %s1654_s11 = inlined_call_operand.hbm [shape: f32[2,8,32], index: 11, kind: output, shape index: {0}]   ;;  %s1655_s12 = inlined_call_operand.hbm [shape: f32[2,4,8,8], index: 12, kind: output, shape index: {1}]  }
   0x1   :  { %1671 = sst [smem:[#allocation19_spill]] %s1643_s0 }
   0x2   :  { %1672 = sst [smem:[#allocation20_spill]] %s1644_s1 }
   0x3   :  { %1673 = sst [smem:[#allocation21_spill]] %s1645_s2 }
   0x4   :  { %1674 = sst [smem:[#allocation22_spill]] %s1646_s3 }
   0x5   :  { %1675 = sst [smem:[#allocation23_spill]] %s1647_s4 }
   0x6   :  { %1676 = sst [smem:[#allocation24_spill]] %s1652_s9 }
   0x7   :  { %1677 = sst [smem:[#allocation25_spill]] %s1653_s10 }
   0x8   :  { %1678 = sst [smem:[#allocation26_spill]] %s1654_s11 }
   0x9   :  { %1679 = sst [smem:[#allocation27_spill]] %s1655_s12 }
   0xa   :  { %18 = vsyncpa [#allocation3], 0 }
   0xb   :  { %20 = vsyncpa [#allocation3 + $0x1], 0 }
   0xc   :  { %21 = vsyncpa [#allocation5], 0 }
   0xd   :  { %23 = vsyncpa [#allocation5 + $0x1], 0  ;;  %s1364_s21 = smov 0   ;;  %s1366_s22 = smov 0  }
   0xe   :  { %s1368_s23 = smov 0   ;;  %s1370_s24 = smov 0  }
   0xf   :  { %s1372_s25 = smov 0   ;;  %s1374_s26 = smov 0  }
  0x10   :  { %s1376_s27 = smov 0   ;;  %s1378_s28 = smov 0  }
  0x11   :  { %s1380_s29 = smov 0   ;;  %s1382_s30 = smov 0  }
  0x12   :  { %s1384_s13 = smov 0  }
  0x13 LB: > { %1680 = sst [smem:[#allocation8_spill]] %s1265_s23  ;;  %s1005_s14 = sadd.s32 4294967295, %s1297_s13   ;;  %s1297_s13 = sphi %s1384_s13, %s29_s13   ;;  %s1293_s30 = sphi %s1382_s30, %s1720_s30   ;;  %s1289_s29 = sphi %s1380_s29, %s1719_s29   ;;  %s1285_s28 = sphi %s1378_s28, %s1718_s28   ;;  %s1281_s27 = sphi %s1376_s27, %s1717_s27   ;;  %s1277_s26 = sphi %s1374_s26, %s1716_s26   ;;  %s1273_s25 = sphi %s1372_s25, %s1724_s25   ;;  %s1269_s24 = sphi %s1370_s24, %s1723_s24   ;;  %s1265_s23 = sphi %s1368_s23, %s1714_s23   ;;  %s1261_s22 = sphi %s1366_s22, %s1722_s22   ;;  %s1257_s21 = sphi %s1364_s21, %s1721_s21  }
  0x14   : > { %1681 = sst [smem:[#allocation9_spill]] %s1269_s24  ;;  %s1006_s15 = sadd.s32 4294967294, %s1297_s13  }
  0x15   : > { %1682 = sst [smem:[#allocation10_spill]] %s1277_s26  ;;  %s38_s16 = sadd.s32 1, %s1289_s29 }
  0x16   : > { %1683 = sst [smem:[#allocation11_spill]] %s1289_s29  ;;  %s41_s17 = sadd.s32 1, %s1293_s30 }
  0x17   : > { %1684 = sst [smem:[#allocation12_spill]] %s1293_s30  ;;  %p39_p0 = scmp.ge.s32.totalorder %s38_s16, 4 }
  0x18   : > { %s329_s18 = sadd.s32 1, %s1277_s26  ;;  %p339_p1 = scmp.ne.s32.totalorder %s1277_s26, %s1273_s25 }
  0x19   : > { %p1426_p2 = scmp.eq.s32.totalorder %s1005_s14, 7  ;;  %s1726_s16 = smov (%p39_p0, %s38_s16), 0 }
  0x1a   : > { %1686 = sst [smem:[#allocation13_spill]] %s1726_s16  ;;  %s1728_s17 = smov (!%p39_p0, %s41_s17), %s1293_s30 }
  0x1b   : > { %p1435_p3 = por %p1426_p2, %p339_p1  ;;  %p345_p4 = scmp.ne.s32.totalorder %s1273_s25, %s1269_s24 }
  0x1c   : > { %p43_p5 = scmp.ge.s32.totalorder %s1728_s17, 2  ;;  %p1441_p6 = scmp.eq.s32.totalorder %s1006_s15, 7 }
  0x1d   : > { %s1687_s20 = scalar_select %p1435_p3, 1, 0 }
  0x1e   : > { %s353_s12 = ssub.s32 %s1289_s29, %s1726_s16  ;;  %s357_s11 = sadd.s32 1, %s1265_s23 }
  0x1f   : > { %1688 = sst [smem:[#allocation14_spill]] %s1687_s20  ;;  %s1730_s17 = smov (%p43_p5, %s1728_s17), 0 }
  0x20   : > { %1690 = sst [smem:[#allocation15_spill]] %s1730_s17  ;;  %p1452_p7 = por %p1441_p6, %p345_p4 }
  0x21   : > { %p367_p8 = scmp.ne.s32.totalorder %s1265_s23, %s1261_s22  ;;  %s326_s24 = ssub.s32 %s1293_s30, %s1730_s17 }
  0x22   : > { %p373_p9 = scmp.ne.s32.totalorder %s1261_s22, %s1257_s21  ;;  %p327_p10 = scmp.eq.s32.totalorder %s326_s24, 0 }
  0x23   : > { %s354_s15 = sor.u32 %s353_s12, %s326_s24  ;;  %p1464_p12 = por %p367_p8, %p1426_p2 }
  0x24   : > { %p355_p11 = scmp.eq.s32.totalorder %s354_s15, 0  ;;  %p1476_p13 = por %p373_p9, %p1441_p6 }
  0x25   : > { %s1469_s16 = scalar_select %p327_p10, %s1277_s26, %s329_s18  }
  0x26   : > { %s1472_s29 = scalar_select %p355_p11, %s1265_s23, %s357_s11  }
  0x27   : > { %1693 = sst [smem:[#allocation16_spill]] %s1469_s16  ;;  %p1009_p0 = scmp.ge.s32.totalorder %s1297_s13, 1 }
  0x28   : > { %1694 = sst [smem:[#allocation17_spill]] %s1472_s29  ;;  %p465_p1 = scmp.lt.s32.totalorder %s1297_s13, 9 }
  0x29   : > { %s1695_s9 = scalar_select %p1476_p13, 1, 0 }
  0x2a   : > { %p466_p4 = pnand %p1009_p0, %p465_p1 }
  0x2b   : > { %1696 = sst [smem:[#allocation18_spill]] %s1695_s9  ;;  %s1666_s12 = sand.u32 (!%p466_p4), 1, %s1273_s25  }
  0x2c   : > { %469 = sbr.rel (%p466_p4) target bundleno = 897 (0x381), region = 64  ;;  %p559_p2 = scmp.lt.s32.totalorder (!%p466_p4), %s1281_s27, 3 }
  0x2d   : > { %s1486_s11 = sshll.u32 (!%p466_p4), %s1666_s12, 3  ;;  %p547_p5 = scmp.lt.s32.totalorder (!%p466_p4), %s1285_s28, 1 }
  0x2e   : > { %s1697_s4 = sld [smem:[#allocation23_spill]] (!%p466_p4)  ;;  %p1028_p6 = scmp.ne.s32.totalorder (!%p466_p4), %s1281_s27, 0 }
  0x2f   : > { %s1698_s3 = sld [smem:[#allocation22_spill]] (!%p466_p4) }
  0x30   : > { %s1699_s0 = sld [smem:[#allocation19_spill]] (!%p466_p4) }
  0x31   : > { %s1490_s24 = scalar_select %p559_p2, %s1281_s27, 3  ;;  %vm604_vm0 = vcmask 261120   ;;  %vm675_vm1 = vcmask 64512   ;;  %vm713_vm2 = vcmask 1043456  }
  0x32   : > { %s548_s18 = scalar_select %p547_p5, %s1285_s28, 1 }
  0x33   : > { %s1494_s19 = sshll.u32 %s1490_s24, 5  ;;  %s1700_s1 = sld [smem:[#allocation20_spill]] }
  0x34   : > { %s571_s23 = scalar_lea.vmem %s1648_s5, %s1494_s19  ;;  %s1508_s9 = sshll.u32 %s548_s18, 3 }
  0x35   : > { %s563_s26 = scalar_lea.vmem %s1698_s3, %s1494_s19  ;;  %v623_v2 = vld [vmem:[%s571_s23 + $0x10] sm:$0xff]  ;;  %v624_v4 = vld [vmem:[%s571_s23 + $0x18] sm:$0xff]  ;;  %v621_v8 = vld [vmem:[%s571_s23] sm:$0xff]  ;;  %s574_s18 = scalar_lea.vmem %s1649_s6, %s1490_s24 }
  0x36   : > { %v596_v0 = vld [vmem:[%s563_s26 + $0x10] sm:$0xff]  ;;  %v597_v1 = vld [vmem:[%s563_s26 + $0x18] sm:$0xff]  ;;  %v594_v5 = vld [vmem:[%s563_s26] sm:$0xff]  ;;  %s550_s30 = scalar_lea.vmem %s1699_s0, %s1508_s9  ;;  %v626_v7 = vpack.c.bf16 %v624_v4, %v623_v2  ;;  %s1701_s14 = scalar_lea.vmem %s1697_s4, %s1490_s24 }
  0x37   : > { %v599_v3 = vpack.c.bf16 %v597_v1, %v596_v0  ;;  %v595_v6 = vld [vmem:[%s563_s26 + $0x8] sm:$0xff]  ;;  %v588_v11 = vld [vmem:[%s550_s30] sm:$0xff]  ;;  %s579_s16 = scalar_lea.vmem %s1650_s7, %s1494_s19  ;;  %s1702_s2 = sld [smem:[#allocation21_spill]] }
  0x38   : > { %v622_v9 = vld [vmem:[%s571_s23 + $0x8] sm:$0xff]  ;;  %v598_v10 = vpack.c.bf16 %v595_v6, %v594_v5  ;;  %640 = vmatpush.bf16.msra.mxu1 %v626_v7  ;;  %v589_v14 = vpack.c.bf16 %v588_v11, %v588_v11  ;;  %v1140_v16 = vld [vmem:[%s574_s18] ss:$0 sm:$0xff]  ;;  %v649_v27 = vld [vmem:[%s579_s16 + $0x10] sm:$0xff]  ;;  %s582_s23 = scalar_lea.vmem %s1651_s8, %s1490_s24  ;;  %s1703_s15 = sld [smem:[#allocation24_spill]] }
  0x39   : > { %s554_s29 = scalar_lea.vmem %s1700_s1, %s1508_s9  ;;  %614 = vmatpush.bf16.msra.mxu0 %v599_v3  ;;  %v625_v12 = vpack.c.bf16 %v622_v9, %v621_v8  ;;  %v1139_v19 = vld [vmem:[%s1701_s14] ss:$0 sm:$0xff]  ;;  %v650_v28 = vld [vmem:[%s579_s16 + $0x18] sm:$0xff]  ;;  %v648_v31 = vld [vmem:[%s579_s16 + $0x8] sm:$0xff]  ;;  %s539_s26 = scalar_lea.vmem [#allocation2], %s1486_s11 }
  0x3a   : > { %v590_v13 = vld [vmem:[%s554_s29] sm:$0xff]  ;;  %v652_v30 = vpack.c.bf16 %v650_v28, %v649_v27  ;;  %s1704_s18 = sld [smem:[#allocation25_spill]] (!%p1028_p6) }
  0x3b   : > { %v591_v15 = vpack.c.bf16 %v590_v13, %v590_v13  ;;  %v647_v29 = vld [vmem:[%s579_s16] sm:$0xff]  ;;  %s1669_s16 = sand.u32 1, %s1261_s22  }
  0x3c   : > { %641 = vmatpush.bf16.msra.mxu1 %v625_v12  ;;  %666 = vmatpush.bf16.msra.mxu2 %v652_v30  ;;  %v651_v32 = vpack.c.bf16 %v648_v31, %v647_v29  ;;  %v1141_v39 = vld [vmem:[%s582_s23] ss:$0 sm:$0xff]  ;;  %s1553_s29 = sshll.u32 %s1669_s16, 3 }
  0x3d   : > { %615 = vmatpush.bf16.msra.mxu0 %v598_v10  ;;  %s558_s12 = scalar_lea.vmem %s1702_s2, %s1508_s9  ;;  %s1021_s9 = sshll.u32 %s1490_s24, 3 }
  0x3e   : > { %v592_v33 = vld [vmem:[%s558_s12] sm:$0xff]  ;;  %s586_s30 = scalar_lea.vmem %s1703_s15, %s1021_s9  ;;  %s1670_s24 = scalar_lea.vmem [#allocation4], %s1553_s29 }
  0x3f   : > { %1023 = vmatmul.msk.bf16.vlgmr.msra.gmra.mxu1 %vm604_vm0, %v591_v15  ;;  %v593_v34 = vpack.c.bf16 %v592_v33, %v592_v33  ;;  %v731_v50 = vld [vmem:[%s586_s30] sm:$0xff] }
  0x40   : > { %1022 = vmatmul.msk.bf16.vlgmr.msra.gmra.mxu0 %vm604_vm0, %v589_v14  ;;  %667 = vmatpush.bf16.msra.mxu2 %v651_v32  ;;  %v732_v51 = vpack.c.bf16 %v731_v50, %v731_v50 }
  0x42   : > { %v737_v52 = vsel %vm713_vm2, %v732_v51, 0 }
  0x43   : > { %1024 = vmatmul.msk.bf16.vlgmr.msra.gmra.mxu2 %vm604_vm0, %v593_v34  ;;  %746 = vmatpush.bf16.msrb.mxu1 %v737_v52 }
  0xbc   : > { %v643_v18 = vpop.f32.mrf.mxu1 }
  0xbd   : > { %v617_v17 = vpop.f32.mrf.mxu0  ;;  %v644_v20 = vadd.f32 %v1140_v16, %v643_v18 }
  0xbe   : > { %v618_v22 = vadd.f32 %v1139_v19, %v617_v17 }
  0xbf   : > { %v674_v21 = vpack.c.bf16 %v644_v20, %v644_v20 }
  0xc0   : > { %v673_v26 = vpack.c.bf16 %v618_v22, %v618_v22 }
  0xc1   : > { %v680_v23 = vsel %vm675_vm1, %v674_v21, 0 }
  0xc2   : > { %689 = vmatpush.bf16.xpose.msra.mxu3 %v680_v23 }
  0xc4   : > { %v645_v25 = vpop.f32.mrf.mxu1 }
  0xc5   : > { %v619_v24 = vpop.f32.mrf.mxu0 }
  0xc6   : > { %v669_v40 = vpop.f32.mrf.mxu2 }
  0xc7   : > { %v670_v41 = vadd.f32 %v1141_v39, %v669_v40 }
  0xc9   : > { %1025 = vmatmul.msk.bf16.vlgmr.msra.gmra.mxu3 %vm675_vm1, %v673_v26  ;;  %v709_v44 = vpack.c.bf16 %v670_v41, %v670_v41 }
  0xcb   : > { %v715_v46 = vsel %vm713_vm2, %v709_v44, 0 }
  0xcc   : > { %724 = vmatpush.bf16.msrb.mxu0 %v715_v46 }
  0xce   : > { %v671_v47 = vpop.f32.mrf.mxu2 }
 0x14c   : > { %v691_v35 = vpop.f32.mrf.mxu3 }
 0x14d   : > { %v695_v36 = vmul.f32 0.35355338, %v691_v35 }
 0x14f   : > { %v696_v37 = vsel %vm675_vm1, %v695_v36, -inf }
 0x150   : > { %697 = vmax.xlane.f32.xlu0 %v696_v37 }
 0x154   : > { %v693_v38 = vpop.f32.mrf.mxu3 }
 0x1c3   : > { %v698_v42 = vpop.xlane.xlu0 %697 }
 0x1c4   : > { %v699_v43 = vsub.f32 %v695_v36, %v698_v42 }
 0x1c6   : > { %v700_v45 = vmul.f32 1.442695, %v699_v43 }
 0x1c8   : > { %1142 = vpow2.f32 %v700_v45 }
 0x1ce   : > { %v1143_v48 = vpop.eup %1142 }
 0x1cf   : > { %v702_v49 = vsel %vm675_vm1, %v1143_v48, 0.0 }
 0x1d0   : > { %703 = vadd.xlane.f32.xlu0 %v702_v49 }
 0x243   : > { %v704_v53 = vpop.xlane.xlu0 %703 }
 0x244   : > { %1144 = vrcp.f32 %v704_v53 }
 0x24a   : > { %v1145_v54 = vpop.eup %1144 }
 0x24b   : > { %v706_v55 = vmul.f32 %v1145_v54, %v1143_v48 }
 0x24d   : > { %707 = vst.msk [vmem:[%s1670_s24] sm:$0xff] %vm675_vm1, %v706_v55  ;;  %v708_v56 = vpack.c.bf16 %v706_v55, %v706_v55 }
 0x24f   : > { %1026 = vmatmul.msk.bf16.vlgmr.msrb.gmra.mxu0 %vm675_vm1, %v708_v56 }
 0x2cc   : > { %v726_v57 = vpop.f32.mrf.mxu0 }
 0x2cd   : > { %v730_v58 = vpack.c.bf16 %v726_v57, %v726_v57 }
 0x2cf   : > { %1027 = vmatmul.msk.bf16.vlgmr.msrb.gmra.mxu1 %vm675_vm1, %v730_v58 }
 0x2d4   : > { %v728_v59 = vpop.f32.mrf.mxu0 }
 0x34c   : > { %v748_v60 = vpop.f32.mrf.mxu1 }
 0x350   : > { %755 = sbr.rel (%p1028_p6) target bundleno = 855 (0x357), region = 68 }
 0x354   : > { %v750_v61 = vpop.f32.mrf.mxu1 }
 0x355   : > { %v1146_v62 = vld [vmem:[%s1704_s18] ss:$0 sm:$0xff] }
 0x356   : > { %760 = vst.msk [vmem:[%s539_s26] sm:$0xff] %vm604_vm0, %v1146_v62 }
 0x357 PF: > { %s1031_s9 = sshll.u32 %s1285_s28, 3  ;;  %s1706_s15 = sld [smem:[#allocation26_spill]] }
 0x358   : > { %s782_s30 = sshll.u32 %s539_s26, 4  ;;  %s1707_s12 = sand.u32 1, %s1273_s25   ;;  %s783_s30 = int_to_ptr.vmem [resolvable:$true] %s782_s30 }
 0x359   : > { %s765_s19 = scalar_lea.sflag [#allocation3], %s1707_s12 }
 0x35d   : > { %v761_v63 = vld [vmem:[%s539_s26] sm:$0xff]  ;;  %s780_s11 = scalar_lea.hbm %s1706_s15, %s1031_s9  ;;  %s1167_s17 = scalar_lea.hbm %s1706_s15, 16 }
 0x35e   : > { %v762_v0 = vadd.f32 %v761_v63, %v748_v60  ;;  %s784_s16 = sshll.u32 %s780_s11, 4  ;;  %s785_s16 = int_to_ptr.hbm [resolvable:$true] %s784_s16 }
 0x35f   : > { %s1161_s18 = sshra.s32 %s785_s16, 4  ;;  %s1162_s18 = int_to_ptr.hbm [resolvable:$true] %s1161_s18 }
 0x360   : > { %763 = vst.msk [vmem:[%s539_s26] sm:$0xff] %vm604_vm0, %v762_v0  ;;  %s1163_s24 = scalar_lea.hbm %s1162_s18, 8  ;;  %p1168_p11 = scmp.lt.s32.totalorder %s1162_s18, %s1706_s15 }
 0x361   : > { %p1164_p8 = scmp.ne.s32.totalorder %s1162_s18, %s1163_s24  ;;  %p1169_p0 = scmp.lt.s32.totalorder %s1167_s17, %s1163_s24 }
 0x363   : > { %p1165_p9 = pnand %p1164_p8, %p1435_p3  ;;  %p1170_p1 = por %p1169_p0, %p1168_p11 }
 0x365   : > { %p1166_p10 = pneg %p1165_p9 }
 0x367   : > { %p1171_p4 = pnand %p1170_p1, %p1166_p10 }
 0x369   : > { %1174 = shalt.err (!%p1171_p4)
}
 0x36a   : > { %1039 = dma.vmem_to_hbm [thread:$0]  (%p1435_p3), %s783_s30, 128, %s785_s16, %s765_s19  }
 0x36b   : > { %s1032_s26 = sshll.u32 %s1285_s28, 2  ;;  %s1708_s11 = scalar_lea.vmem [#allocation4], %s1553_s29 }
 0x36c   : > { %s798_s0 = sshll.u32 %s1708_s11, 4  ;;  %s794_s1 = sadd.s32 %s1281_s27, %s1032_s26  ;;  %s799_s0 = int_to_ptr.vmem [resolvable:$true] %s798_s0 }
 0x36d   : > { %s1033_s12 = sshll.u32 %s794_s1, 3  ;;  %s1709_s18 = sld [smem:[#allocation27_spill]] }
 0x36e   : > { %s1710_s14 = sand.u32 1, %s1261_s22  }
 0x36f   : > { %s770_s23 = scalar_lea.sflag [#allocation5], %s1710_s14 }
 0x373   : > { %s796_s24 = scalar_lea.hbm %s1709_s18, %s1033_s12  ;;  %s1195_s27 = scalar_lea.hbm %s1709_s18, 64 }
 0x374   : > { %s800_s17 = sshll.u32 %s796_s24, 4  ;;  %s801_s17 = int_to_ptr.hbm [resolvable:$true] %s800_s17 }
 0x375   : > { %s1189_s3 = sshra.s32 %s801_s17, 4  ;;  %s1190_s3 = int_to_ptr.hbm [resolvable:$true] %s1189_s3 }
 0x376   : > { %s1191_s4 = scalar_lea.hbm %s1190_s3, 8  ;;  %p1196_p6 = scmp.lt.s32.totalorder %s1190_s3, %s1709_s18 }
 0x377   : > { %p1192_p2 = scmp.ne.s32.totalorder %s1190_s3, %s1191_s4  ;;  %p1197_p8 = scmp.lt.s32.totalorder %s1195_s27, %s1191_s4 }
 0x379   : > { %p1193_p3 = pnand %p1192_p2, %p1464_p12  ;;  %p1198_p9 = por %p1197_p8, %p1196_p6 }
 0x37b   : > { %p1194_p5 = pneg %p1193_p3 }
 0x37d   : > { %p1199_p10 = pnand %p1198_p9, %p1194_p5 }
 0x37f   : > { %1202 = shalt.err (!%p1199_p10)
}
 0x380   : > { %1040 = dma.vmem_to_hbm [thread:$0]  (%p1464_p12), %s799_s0, 128, %s801_s17, %s770_s23  }
 0x381 PF: > { %s1711_s2 = sld [smem:[#allocation9_spill]]  ;;  %p1050_p11 = scmp.ge.s32.totalorder %s1297_s13, 2 }
 0x383   : > { %p1044_p0 = pnand %p1050_p11, %p1452_p7 }
 0x385   : > { %p1045_p1 = pneg %p1044_p0 }
 0x387   : > { %s812_s19 = sand.u32 1, %s1711_s2  }
 0x388   : > { %s813_s26 = scalar_lea.sflag [#allocation3], %s812_s19 }
 0x389   : > { %1248 = dma.done.wait (%p1045_p1), %s813_s26, 128  }
 0x38a   : > { %1250 = vsyncadd (%p1045_p1), %s813_s26, 4294967168  ;;  %s822_s4 = sand.u32 1, %s1257_s21   ;;  %p1047_p4 = pnand %p1050_p11, %p1476_p13 }
 0x38b   : > { %s823_s20 = scalar_lea.sflag [#allocation5], %s822_s4 }
 0x38c   : > { %p1048_p2 = pneg %p1047_p4 }
 0x38e   : > { %1252 = dma.done.wait (%p1048_p2), %s823_s20, 128  }
 0x38f   : > { %1254 = vsyncadd (%p1048_p2), %s823_s20, 4294967168  ;;  %s29_s13 = sadd.s32 1, %s1297_s13   ;;  %s1713_s11 = sld [smem:[#allocation8_spill]] }
 0x390   : > { %p26_p12 = scmp.ge.s32.totalorder %s29_s13, 10   ;;  %s1714_s23 = sld [smem:[#allocation17_spill]] }
 0x391   : > { %s1715_s10 = sld [smem:[#allocation10_spill]]  ;;  %s1721_s21 = smov %s1261_s22 }
 0x392   : > { %s1716_s26 = sld [smem:[#allocation16_spill]]  ;;  %s1723_s24 = smov %s1273_s25 }
 0x393   : > { %s1717_s27 = sld [smem:[#allocation11_spill]]  ;;  %28 = sbr.rel (!%p26_p12) target bundleno = 19 (0x13), region = 147 }
 0x394   : > { %s1718_s28 = sld [smem:[#allocation12_spill]] }
 0x395   : > { %s1719_s29 = sld [smem:[#allocation13_spill]]  ;;  %s1722_s22 = smov %s1713_s11 }
 0x396   : > { %s1720_s30 = sld [smem:[#allocation15_spill]] }
 0x397   : > { %s1724_s25 = smov %s1715_s10 }
 0x398   :  { %829 = vsyncpa [#allocation3], 1 }
 0x399   :  { %831 = vsyncpa [#allocation3 + $0x1], 1 }
 0x39a   :  { %832 = vsyncpa [#allocation5], 1 }
 0x39b   :  { %834 = vsyncpa [#allocation5 + $0x1], 1 }

</bundles_post_ra>
